<compile_context>
chip_gen: v7x
topology: tpu7x:2x2x1
jax: 0.10.0
libtpu: 0.0.40
codegen_flags: <defaults>
</compile_context>

<pallas_src>
import functools
import math

import jax
import jax.numpy as jnp
from jax.experimental import pallas as pl
from jax.experimental.pallas import tpu as pltpu


def _round_up(x, m):
    return (x + m - 1) // m * m


# ----------------------------------------------------------------------------
# Pallas kernel: full TransTabFeatureProcessor forward in one invocation.
# ----------------------------------------------------------------------------
def feature_processor_kernel(
    ids_ref,        # (T, 1)          int32: [num-name | cat | bin] tokens, 8-padded per segment
    num_mask_ref,   # (1, T_num_pad)  f32: flattened num_att_mask (zero on pad slots)
    x_num_ref,      # (B*N_num, 1)    f32: numerical feature values
    table_ref,      # (V_pad, D_pad)  f32: word-embedding table (zero-padded)
    ln_g_ref,       # (1, D_pad)      f32: word-embedding LayerNorm gamma (zero-padded)
    ln_b_ref,       # (1, D_pad)      f32: word-embedding LayerNorm beta  (zero-padded)
    num_bias_ref,   # (1, D_pad)      f32: TransTabNumEmbedding.num_bias  (zero-padded)
    w_align_ref,    # (D_pad, D_pad)  f32: align_layer weight (right-multiply, zero-padded)
    num_out_ref,    # (B*N_num, D_pad)    f32 output (numerical branch)
    cat_out_ref,    # (T_cat_pad, D_pad)  f32 output (categorical branch, flat rows)
    bin_out_ref,    # (T_bin_pad, D_pad)  f32 output (binary branch, flat rows)
    *, B, N_num, L_num, T_num_pad, T_cat_pad, D, eps,
):
    V_pad, D_pad = table_ref.shape
    T = ids_ref.shape[0]
    inv_d = 1.0 / D

    # ---- 1) word embedding for ALL tokens at once: one-hot gather on the MXU.
    ids = ids_ref[...]                                               # (T, 1)
    vocab_iota = jax.lax.broadcasted_iota(jnp.int32, (T, V_pad), 1)
    onehot = (vocab_iota == ids).astype(jnp.float32)                 # (T, V_pad)
    tok = jnp.dot(onehot, table_ref[...], preferred_element_type=jnp.float32)

    # ---- 2) LayerNorm over the TRUE hidden dim (padded lanes stay exactly 0:
    #         table/gamma/beta are zero-padded, so diff*gamma+beta == 0 there).
    lane = jax.lax.broadcasted_iota(jnp.int32, (1, D_pad), 1)
    lane_mask = (lane < D).astype(jnp.float32)
    mu = jnp.sum(tok, axis=-1, keepdims=True) * inv_d
    diff = (tok - mu) * lane_mask
    var = jnp.sum(diff * diff, axis=-1, keepdims=True) * inv_d
    tok = diff * jax.lax.rsqrt(var + eps) * ln_g_ref[...] + ln_b_ref[...]

    # 8-aligned views of the token block (segments were sublane-padded host-side).
    tok_num = tok[:T_num_pad]                                        # (T_num_pad, D_pad)
    tok_rest = tok[T_num_pad:]                                       # (T_cat_pad+T_bin_pad, D_pad)

    # ---- 3) numerical column embeddings: masked average over column-name
    #         tokens expressed as one small MXU matmul (block-diag weights).
    row = jax.lax.broadcasted_iota(jnp.int32, (N_num, T_num_pad), 0)
    col = jax.lax.broadcasted_iota(jnp.int32, (N_num, T_num_pad), 1)
    lo = row * L_num
    belongs = jnp.logical_and(col >= lo, col < lo + L_num)
    w = belongs.astype(jnp.float32) * num_mask_ref[...]              # (N_num, T_num_pad)
    denom = jnp.sum(w, axis=1, keepdims=True)                        # per-column mask sum
    col_emb = jnp.dot(w, tok_num, preferred_element_type=jnp.float32) / denom

    # ---- 4) bias-free align layer; exploit linearity for the numerical branch
    #         (only N_num + 1 + (cat|bin) rows go through the MXU, not B*N_num).
    w_align = w_align_ref[...]
    col_aligned = jnp.dot(col_emb, w_align, preferred_element_type=jnp.float32)
    bias_aligned = jnp.dot(num_bias_ref[...], w_align,
                           preferred_element_type=jnp.float32)       # (1, D_pad)
    rest_aligned = jnp.dot(tok_rest, w_align, preferred_element_type=jnp.float32)

    # ---- 5) numerical feature embeddings: x * (col @ W) + (num_bias @ W)
    col_rep = jnp.tile(col_aligned, (B, 1))                          # (B*N_num, D_pad)
    num_out_ref[...] = x_num_ref[...] * col_rep + bias_aligned

    # ---- 6) contiguous, lane-dense stores (8-aligned row offsets).
    cat_out_ref[...] = rest_aligned[:T_cat_pad]
    bin_out_ref[...] = rest_aligned[T_cat_pad:]


# ----------------------------------------------------------------------------
# Wrapper: host-side layout plumbing (padding / reassembly) + single pallas_call.
# ----------------------------------------------------------------------------
def transtab_feature_processor(params, x_num, num_col_input_ids, num_att_mask,
                               x_cat_input_ids, cat_att_mask,
                               x_bin_input_ids, bin_att_mask, *, eps=1e-5):
    B, N_num = x_num.shape
    _, L_num = num_col_input_ids.shape
    _, L_cat = x_cat_input_ids.shape
    _, L_bin = x_bin_input_ids.shape
    V, D = params["table"].shape

    D_pad = _round_up(D, 128)
    V_pad = _round_up(V, 128)
    T_num, T_cat, T_bin = N_num * L_num, B * L_cat, B * L_bin
    T_num_pad = _round_up(T_num, 8)
    T_cat_pad = _round_up(T_cat, 8)
    T_bin_pad = _round_up(T_bin, 8)

    def pad_rows(v, n):          # 1-D pad (with zeros / pad-token id 0)
        return jnp.pad(v, (0, n - v.shape[0]))

    def pad2(a, r, c):           # 2-D zero pad to (r, c)
        return jnp.pad(a, ((0, r - a.shape[0]), (0, c - a.shape[1])))

    # Fused, sublane-padded token-id stream; flattened zero-padded num mask;
    # column vector of numerical values.  All free XLA-side layout plumbing.
    all_ids = jnp.concatenate([
        pad_rows(num_col_input_ids.reshape(-1).astype(jnp.int32), T_num_pad),
        pad_rows(x_cat_input_ids.reshape(-1).astype(jnp.int32), T_cat_pad),
        pad_rows(x_bin_input_ids.reshape(-1).astype(jnp.int32), T_bin_pad),
    ]).reshape(-1, 1)
    num_mask_flat = pad_rows(num_att_mask.astype(jnp.float32).reshape(-1),
                             T_num_pad).reshape(1, T_num_pad)
    x_num_col = x_num.astype(jnp.float32).reshape(B * N_num, 1)

    # Lane-pad all weights to D_pad (zeros) so the kernel is fully lane-dense.
    table_p = pad2(params["table"].astype(jnp.float32), V_pad, D_pad)
    ln_g_p = pad2(params["ln_g"].astype(jnp.float32), 1, D_pad)
    ln_b_p = pad2(params["ln_b"].astype(jnp.float32), 1, D_pad)
    num_bias_p = pad2(params["num_bias"].astype(jnp.float32), 1, D_pad)
    w_align_p = pad2(params["w_align"].astype(jnp.float32), D_pad, D_pad)

    kernel = functools.partial(
        feature_processor_kernel,
        B=B, N_num=N_num, L_num=L_num,
        T_num_pad=T_num_pad, T_cat_pad=T_cat_pad, D=D, eps=eps)

    vmem = lambda: pl.BlockSpec(memory_space=pltpu.MemorySpace.VMEM)

    num_out, cat_out, bin_out = pl.pallas_call(
        kernel,
        out_shape=(jax.ShapeDtypeStruct((B * N_num, D_pad), jnp.float32),
                   jax.ShapeDtypeStruct((T_cat_pad, D_pad), jnp.float32),
                   jax.ShapeDtypeStruct((T_bin_pad, D_pad), jnp.float32)),
        in_specs=[vmem() for _ in range(8)],
        out_specs=(vmem(), vmem(), vmem()),
    )(all_ids, num_mask_flat, x_num_col, table_p, ln_g_p, ln_b_p,
      num_bias_p, w_align_p)

    # Reassemble (B, S, D) from the flat lane-dense kernel outputs (pure layout).
    num_emb = num_out[:, :D].reshape(B, N_num, D)
    cat_emb = cat_out[:T_cat, :D].reshape(B, L_cat, D)
    bin_emb = bin_out[:T_bin, :D].reshape(B, L_bin, D)
    embedding = jnp.concatenate([num_emb, cat_emb, bin_emb], axis=1)

    # attention_mask is pure concatenation (no compute) -> wrapper side.
    attention_mask = jnp.concatenate([
        jnp.ones((B, N_num), jnp.float32),
        cat_att_mask.astype(jnp.float32),
        bin_att_mask.astype(jnp.float32)], axis=1)
    return {"embedding": embedding, "attention_mask": attention_mask}


# ----------------------------------------------------------------------------
# Pure-JAX reference (mirrors the PyTorch forward) used for validation.
# ----------------------------------------------------------------------------
def reference_forward(params, x_num, num_col_input_ids, num_att_mask,
                      x_cat_input_ids, cat_att_mask,
                      x_bin_input_ids, bin_att_mask, eps=1e-5):
    table = params["table"]
    g = params["ln_g"][0]
    b = params["ln_b"][0]

    def word_emb(ids):
        e = table[ids]
        mu = e.mean(-1, keepdims=True)
        var = ((e - mu) ** 2).mean(-1, keepdims=True)
        return (e - mu) / jnp.sqrt(var + eps) * g + b

    m = num_att_mask
    num_col = word_emb(num_col_input_ids)                            # (N, L, D)
    num_col = (num_col * m[..., None]).sum(1) / m.sum(1, keepdims=True)
    num_feat = num_col[None, :, :] * x_num[:, :, None] + params["num_bias"]
    num_feat = num_feat @ params["w_align"]
    cat_feat = word_emb(x_cat_input_ids) @ params["w_align"]
    bin_feat = word_emb(x_bin_input_ids) @ params["w_align"]
    emb = jnp.concatenate([num_feat, cat_feat, bin_feat], axis=1)
    B = x_num.shape[0]
    mask = jnp.concatenate(
        [jnp.ones((B, num_feat.shape[1]), jnp.float32),
         cat_att_mask.astype(jnp.float32),
         bin_att_mask.astype(jnp.float32)], axis=1)
    return emb, mask


if __name__ == "__main__":
    # Small shapes consistent with the module: hidden_dim=32, vocab=64,
    # batch=2, 4 numerical columns (5 name-tokens each), 6 categorical tokens,
    # 2 binary tokens  ->  sequence length S = 4 + 6 + 2 = 12.
    B, D, V = 2, 32, 64
    N_NUM, L_NUM, L_CAT, L_BIN = 4, 5, 6, 2

    root = jax.random.PRNGKey(0)
    ks = jax.random.split(root, 10)

    params = {
        "table": jax.random.normal(ks[0], (V, D), jnp.float32) * math.sqrt(2.0 / D),
        "ln_g": jnp.ones((1, D), jnp.float32),
        "ln_b": jnp.zeros((1, D), jnp.float32),
        "num_bias": jax.random.uniform(
            ks[1], (1, D), jnp.float32,
            minval=-1.0 / math.sqrt(D), maxval=1.0 / math.sqrt(D)),
        "w_align": jax.random.normal(ks[2], (D, D), jnp.float32) / math.sqrt(D),
    }

    x_num = jax.random.normal(ks[3], (B, N_NUM), jnp.float32)
    num_col_input_ids = jax.random.randint(ks[4], (N_NUM, L_NUM), 0, V)
    num_att_mask = (jax.random.uniform(ks[5], (N_NUM, L_NUM)) > 0.3).astype(jnp.float32)
    num_att_mask = num_att_mask.at[:, 0].set(1.0)   # >=1 valid token per column name
    x_cat_input_ids = jax.random.randint(ks[6], (B, L_CAT), 0, V)
    cat_att_mask = (jax.random.uniform(ks[7], (B, L_CAT)) > 0.2).astype(jnp.float32)
    x_bin_input_ids = jax.random.randint(ks[8], (B, L_BIN), 0, V)
    bin_att_mask = jnp.ones((B, L_BIN), jnp.float32)

    out = transtab_feature_processor(
        params, x_num, num_col_input_ids, num_att_mask,
        x_cat_input_ids, cat_att_mask, x_bin_input_ids, bin_att_mask)
    emb = jax.block_until_ready(out["embedding"])
    att = jax.block_until_ready(out["attention_mask"])

    ref_emb, ref_att = reference_forward(
        params, x_num, num_col_input_ids, num_att_mask,
        x_cat_input_ids, cat_att_mask, x_bin_input_ids, bin_att_mask)

    assert emb.shape == (B, N_NUM + L_CAT + L_BIN, D)
    assert att.shape == (B, N_NUM + L_CAT + L_BIN)
    max_err = float(jnp.max(jnp.abs(emb - ref_emb)))
    assert jnp.allclose(emb, ref_emb, atol=1e-4, rtol=1e-4), max_err
    assert jnp.allclose(att, ref_att), "attention mask mismatch"

    print("KERNEL_OK")
</pallas_src>

<mosaic_0001>
module attributes {stable_mosaic.version = 11 : i64} {
  func.func @feature_processor_kernel(%arg0: memref<48x1xi32, #tpu.memory_space<vmem>>, %arg1: memref<1x24xf32, #tpu.memory_space<vmem>>, %arg2: memref<8x1xf32, #tpu.memory_space<vmem>>, %arg3: memref<128x128xf32, #tpu.memory_space<vmem>>, %arg4: memref<1x128xf32, #tpu.memory_space<vmem>>, %arg5: memref<1x128xf32, #tpu.memory_space<vmem>>, %arg6: memref<1x128xf32, #tpu.memory_space<vmem>>, %arg7: memref<128x128xf32, #tpu.memory_space<vmem>>, %arg8: memref<8x128xf32, #tpu.memory_space<vmem>>, %arg9: memref<16x128xf32, #tpu.memory_space<vmem>>, %arg10: memref<8x128xf32, #tpu.memory_space<vmem>>) attributes {dimension_semantics = [], scalar_prefetch = 0 : i64, scratch_operands = 0 : i64, tpu.core_type = #tpu.core_type<tc>} {
    %c0 = arith.constant 0 : index
    %c0_0 = arith.constant 0 : index
    %0 = vector.load %arg0[%c0, %c0_0] : memref<48x1xi32, #tpu.memory_space<vmem>>, vector<48x1xi32>
    %1 = tpu.iota {dimensions = array<i32: 1>} : vector<48x128xi32>
    %2 = vector.broadcast %0 : vector<48x1xi32> to vector<48x128xi32>
    %3 = arith.cmpi eq, %1, %2 : vector<48x128xi32>
    %4 = arith.extui %3 : vector<48x128xi1> to vector<48x128xi32>
    %5 = arith.sitofp %4 : vector<48x128xi32> to vector<48x128xf32>
    %c0_1 = arith.constant 0 : index
    %c0_2 = arith.constant 0 : index
    %6 = vector.load %arg3[%c0_1, %c0_2] : memref<128x128xf32, #tpu.memory_space<vmem>>, vector<128x128xf32>
    %cst = arith.constant dense<0.000000e+00> : vector<48x128xf32>
    %7 = tpu.matmul %5, %6, %cst {dimension_numbers = #tpu.dot_dimension_numbers<[1], [0], [0], [1], [0, 0, 1, 1], [], []>} : vector<48x128xf32>, vector<128x128xf32>, vector<48x128xf32> -> vector<48x128xf32>
    %8 = tpu.iota {dimensions = array<i32: 1>} : vector<1x128xi32>
    %c32_i32 = arith.constant 32 : i32
    %9 = vector.broadcast %c32_i32 : i32 to vector<1x128xi32>
    %10 = arith.cmpi slt, %8, %9 : vector<1x128xi32>
    %11 = arith.extui %10 : vector<1x128xi1> to vector<1x128xi32>
    %12 = arith.sitofp %11 : vector<1x128xi32> to vector<1x128xf32>
    %cst_3 = arith.constant dense<0.000000e+00> : vector<48xf32>
    %13 = vector.multi_reduction <add>, %7, %cst_3 [1] : vector<48x128xf32> to vector<48xf32>
    %14 = vector.shape_cast %13 : vector<48xf32> to vector<48x1xf32>
    %cst_4 = arith.constant 3.125000e-02 : f32
    %15 = vector.broadcast %cst_4 : f32 to vector<48x1xf32>
    %16 = arith.mulf %14, %15 : vector<48x1xf32>
    %17 = vector.broadcast %16 : vector<48x1xf32> to vector<48x128xf32>
    %18 = arith.subf %7, %17 : vector<48x128xf32>
    %19 = vector.broadcast %12 : vector<1x128xf32> to vector<48x128xf32>
    %20 = arith.mulf %18, %19 : vector<48x128xf32>
    %21 = arith.mulf %20, %20 : vector<48x128xf32>
    %cst_5 = arith.constant dense<0.000000e+00> : vector<48xf32>
    %22 = vector.multi_reduction <add>, %21, %cst_5 [1] : vector<48x128xf32> to vector<48xf32>
    %23 = vector.shape_cast %22 : vector<48xf32> to vector<48x1xf32>
    %cst_6 = arith.constant 3.125000e-02 : f32
    %24 = vector.broadcast %cst_6 : f32 to vector<48x1xf32>
    %25 = arith.mulf %23, %24 : vector<48x1xf32>
    %cst_7 = arith.constant 9.99999974E-6 : f32
    %26 = vector.broadcast %cst_7 : f32 to vector<48x1xf32>
    %27 = arith.addf %25, %26 : vector<48x1xf32>
    %28 = math.rsqrt %27 : vector<48x1xf32>
    %29 = vector.broadcast %28 : vector<48x1xf32> to vector<48x128xf32>
    %30 = arith.mulf %20, %29 : vector<48x128xf32>
    %c0_8 = arith.constant 0 : index
    %c0_9 = arith.constant 0 : index
    %31 = vector.load %arg4[%c0_8, %c0_9] : memref<1x128xf32, #tpu.memory_space<vmem>>, vector<1x128xf32>
    %32 = vector.broadcast %31 : vector<1x128xf32> to vector<48x128xf32>
    %33 = arith.mulf %30, %32 : vector<48x128xf32>
    %c0_10 = arith.constant 0 : index
    %c0_11 = arith.constant 0 : index
    %34 = vector.load %arg5[%c0_10, %c0_11] : memref<1x128xf32, #tpu.memory_space<vmem>>, vector<1x128xf32>
    %35 = vector.broadcast %34 : vector<1x128xf32> to vector<48x128xf32>
    %36 = arith.addf %33, %35 : vector<48x128xf32>
    %37 = vector.extract_strided_slice %36 {offsets = [0, 0], sizes = [24, 128], strides = [1, 1]} : vector<48x128xf32> to vector<24x128xf32>
    %38 = vector.extract_strided_slice %36 {offsets = [24, 0], sizes = [24, 128], strides = [1, 1]} : vector<48x128xf32> to vector<24x128xf32>
    %39 = tpu.iota {dimensions = array<i32: 0>} : vector<4x24xi32>
    %40 = tpu.iota {dimensions = array<i32: 1>} : vector<4x24xi32>
    %c5_i32 = arith.constant 5 : i32
    %41 = vector.broadcast %c5_i32 : i32 to vector<4x24xi32>
    %42 = arith.muli %39, %41 : vector<4x24xi32>
    %43 = arith.cmpi sge, %40, %42 : vector<4x24xi32>
    %c5_i32_12 = arith.constant 5 : i32
    %44 = vector.broadcast %c5_i32_12 : i32 to vector<4x24xi32>
    %45 = arith.addi %42, %44 : vector<4x24xi32>
    %46 = arith.cmpi slt, %40, %45 : vector<4x24xi32>
    %47 = arith.andi %43, %46 : vector<4x24xi1>
    %48 = arith.extui %47 : vector<4x24xi1> to vector<4x24xi32>
    %49 = arith.sitofp %48 : vector<4x24xi32> to vector<4x24xf32>
    %c0_13 = arith.constant 0 : index
    %c0_14 = arith.constant 0 : index
    %50 = vector.load %arg1[%c0_13, %c0_14] : memref<1x24xf32, #tpu.memory_space<vmem>>, vector<1x24xf32>
    %51 = vector.broadcast %50 : vector<1x24xf32> to vector<4x24xf32>
    %52 = arith.mulf %49, %51 : vector<4x24xf32>
    %cst_15 = arith.constant dense<0.000000e+00> : vector<4xf32>
    %53 = vector.multi_reduction <add>, %52, %cst_15 [1] : vector<4x24xf32> to vector<4xf32>
    %54 = vector.shape_cast %53 : vector<4xf32> to vector<4x1xf32>
    %cst_16 = arith.constant dense<0.000000e+00> : vector<4x128xf32>
    %55 = tpu.matmul %52, %37, %cst_16 {dimension_numbers = #tpu.dot_dimension_numbers<[1], [0], [0], [1], [0, 0, 1, 1], [], []>} : vector<4x24xf32>, vector<24x128xf32>, vector<4x128xf32> -> vector<4x128xf32>
    %56 = vector.broadcast %54 : vector<4x1xf32> to vector<4x128xf32>
    %57 = arith.divf %55, %56 : vector<4x128xf32>
    %c0_17 = arith.constant 0 : index
    %c0_18 = arith.constant 0 : index
    %58 = vector.load %arg7[%c0_17, %c0_18] : memref<128x128xf32, #tpu.memory_space<vmem>>, vector<128x128xf32>
    %cst_19 = arith.constant dense<0.000000e+00> : vector<4x128xf32>
    %59 = tpu.matmul %57, %58, %cst_19 {dimension_numbers = #tpu.dot_dimension_numbers<[1], [0], [0], [1], [0, 0, 1, 1], [], []>} : vector<4x128xf32>, vector<128x128xf32>, vector<4x128xf32> -> vector<4x128xf32>
    %c0_20 = arith.constant 0 : index
    %c0_21 = arith.constant 0 : index
    %60 = vector.load %arg6[%c0_20, %c0_21] : memref<1x128xf32, #tpu.memory_space<vmem>>, vector<1x128xf32>
    %cst_22 = arith.constant dense<0.000000e+00> : vector<1x128xf32>
    %61 = tpu.matmul %60, %58, %cst_22 {dimension_numbers = #tpu.dot_dimension_numbers<[1], [0], [0], [1], [0, 0, 1, 1], [], []>} : vector<1x128xf32>, vector<128x128xf32>, vector<1x128xf32> -> vector<1x128xf32>
    %cst_23 = arith.constant dense<0.000000e+00> : vector<24x128xf32>
    %62 = tpu.matmul %38, %58, %cst_23 {dimension_numbers = #tpu.dot_dimension_numbers<[1], [0], [0], [1], [0, 0, 1, 1], [], []>} : vector<24x128xf32>, vector<128x128xf32>, vector<24x128xf32> -> vector<24x128xf32>
    %63 = tpu.concatenate %59, %59 in 0 : vector<4x128xf32>, vector<4x128xf32> -> vector<8x128xf32>
    %c0_24 = arith.constant 0 : index
    %c0_25 = arith.constant 0 : index
    %64 = vector.load %arg2[%c0_24, %c0_25] : memref<8x1xf32, #tpu.memory_space<vmem>>, vector<8x1xf32>
    %65 = vector.broadcast %64 : vector<8x1xf32> to vector<8x128xf32>
    %66 = arith.mulf %65, %63 : vector<8x128xf32>
    %67 = vector.broadcast %61 : vector<1x128xf32> to vector<8x128xf32>
    %68 = arith.addf %66, %67 : vector<8x128xf32>
    %c0_26 = arith.constant 0 : index
    %c0_27 = arith.constant 0 : index
    %69 = vector.load %arg8[%c0_26, %c0_27] : memref<8x128xf32, #tpu.memory_space<vmem>>, vector<8x128xf32>
    tpu.vector_store %arg8[%c0_26, %c0_27], %68 {strides = array<i32>} : memref<8x128xf32, #tpu.memory_space<vmem>>, vector<8x128xf32>,
    %70 = vector.extract_strided_slice %62 {offsets = [0, 0], sizes = [16, 128], strides = [1, 1]} : vector<24x128xf32> to vector<16x128xf32>
    %c0_28 = arith.constant 0 : index
    %c0_29 = arith.constant 0 : index
    %71 = vector.load %arg9[%c0_28, %c0_29] : memref<16x128xf32, #tpu.memory_space<vmem>>, vector<16x128xf32>
    tpu.vector_store %arg9[%c0_28, %c0_29], %70 {strides = array<i32>} : memref<16x128xf32, #tpu.memory_space<vmem>>, vector<16x128xf32>,
    %72 = vector.extract_strided_slice %62 {offsets = [16, 0], sizes = [8, 128], strides = [1, 1]} : vector<24x128xf32> to vector<8x128xf32>
    %c0_30 = arith.constant 0 : index
    %c0_31 = arith.constant 0 : index
    %73 = vector.load %arg10[%c0_30, %c0_31] : memref<8x128xf32, #tpu.memory_space<vmem>>, vector<8x128xf32>
    tpu.vector_store %arg10[%c0_30, %c0_31], %72 {strides = array<i32>} : memref<8x128xf32, #tpu.memory_space<vmem>>, vector<8x128xf32>,
    return
  }
}

</mosaic_0001>

<bundles_post_ra>
// kernel: tpu_custom_call.1
= control target key start
LH: loop header
LB: loop body
LE: loop exit
PB: predicated region body
PF: predicated region fallthrough
CT: control target
= control target key end

     0   :  { %16 = vsyncpa [#allocation3], 0  ;;  %s1500_s0 = inlined_call_operand.vmem [shape: s32[48,1], index: 0, kind: input, shape index: {}]   ;;  %s1501_s1 = inlined_call_operand.vmem [shape: f32[1,24], index: 1, kind: input, shape index: {}]   ;;  %s1502_s2 = inlined_call_operand.vmem [shape: f32[8,1], index: 2, kind: input, shape index: {}]   ;;  %s1503_s3 = inlined_call_operand.hbm [shape: f32[128,128], index: 3, kind: input, shape index: {}]   ;;  %s1504_s4 = inlined_call_operand.vmem [shape: f32[1,128], index: 4, kind: input, shape index: {}]   ;;  %s1505_s5 = inlined_call_operand.vmem [shape: f32[1,128], index: 5, kind: input, shape index: {}]   ;;  %s1506_s6 = inlined_call_operand.vmem [shape: f32[1,128], index: 6, kind: input, shape index: {}]   ;;  %s1507_s7 = inlined_call_operand.hbm [shape: f32[128,128], index: 7, kind: input, shape index: {}]   ;;  %s1508_s8 = inlined_call_operand.hbm [shape: f32[8,128], index: 8, kind: output, shape index: {0}]   ;;  %s1509_s9 = inlined_call_operand.hbm [shape: f32[16,128], index: 9, kind: output, shape index: {1}]   ;;  %s1510_s10 = inlined_call_operand.hbm [shape: f32[8,128], index: 10, kind: output, shape index: {2}]  }
   0x1   :  { %17 = vsyncpa [#allocation6], 0 }
   0x2   :  { %18 = vsyncpa [#allocation4], 0 }
   0x3   :  { %19 = vsyncpa [#allocation9], 0  ;;  %s1229_s13 = smov [#allocation2]   ;;  %s1111_s17 = scalar_lea.hbm %s1503_s3, 2048 }
   0x4   :  { %s31_s14 = sshll.u32 %s1229_s13, 4  ;;  %p1112_p0 = scmp.ne.s32.totalorder %s1503_s3, %s1111_s17  ;;  %s32_s14 = int_to_ptr.vmem [resolvable:$true] %s31_s14 }
   0x5   :  { %p1115_p1 = scmp.lt.u32.totalorder %s1111_s17, %s1503_s3 }
   0x7   :  { %p1117_p2 = pnand %p1115_p1, %p1112_p0 }
   0x9   :  { %1120 = shalt.err (!%p1117_p2)
}
   0xa   :  { %s1121_s22 = scalar_lea.vmem %s32_s14, 2048  ;;  %p1126_p4 = scmp.lt.s32.totalorder %s32_s14, %s32_s14 }
   0xb   :  { %p1122_p3 = scmp.ne.s32.totalorder %s32_s14, %s1121_s22  ;;  %p1127_p5 = scmp.lt.s32.totalorder %s1121_s22, %s1121_s22 }
   0xd   :  { %p1128_p6 = por %p1127_p5, %p1126_p4 }
   0xf   :  { %p1129_p7 = pnand %p1128_p6, %p1122_p3 }
  0x11   :  { %1132 = shalt.err (!%p1129_p7)
}
  0x12   :  { %s1230_s23 = smov 128   ;;  %s1231_s24 = smov 8  }
  0x13   :  { %37 = dma.hbm_to_vmem [thread:$0]  %s1503_s3, 2048, %s32_s14, [#allocation3], %s1230_s23, %s1230_s23, %s1231_s24  }
  0x14   :  { %s1232_s27 = smov [#allocation5]   ;;  %s1133_s11 = scalar_lea.hbm %s1507_s7, 2048 }
  0x15   :  { %s49_s28 = sshll.u32 %s1232_s27, 4  ;;  %p1134_p8 = scmp.ne.s32.totalorder %s1507_s7, %s1133_s11  ;;  %s50_s28 = int_to_ptr.vmem [resolvable:$true] %s49_s28 }
  0x16   :  { %p1137_p9 = scmp.lt.u32.totalorder %s1133_s11, %s1507_s7 }
  0x18   :  { %p1139_p10 = pnand %p1137_p9, %p1134_p8 }
  0x1a   :  { %1142 = shalt.err (!%p1139_p10)
}
  0x1b   :  { %s1143_s17 = scalar_lea.vmem %s50_s28, 2048  ;;  %p1148_p12 = scmp.lt.s32.totalorder %s50_s28, %s50_s28 }
  0x1c   :  { %p1144_p11 = scmp.ne.s32.totalorder %s50_s28, %s1143_s17  ;;  %p1149_p13 = scmp.lt.s32.totalorder %s1143_s17, %s1143_s17 }
  0x1e   :  { %p1150_p0 = por %p1149_p13, %p1148_p12 }
  0x20   :  { %p1151_p1 = pnand %p1150_p0, %p1144_p11 }
  0x22   :  { %1154 = shalt.err (!%p1151_p1)
}
  0x23   :  { %55 = dma.hbm_to_vmem [thread:$0]  %s1507_s7, 2048, %s50_s28, [#allocation6], %s1230_s23, %s1230_s23, %s1231_s24  }
  0x24   :  { %1221 = dma.done.wait [#allocation3], 2048  }
  0x25   :  { %1222 = vsyncadd [#allocation3], 4294965248 }
  0x26   :  { %1223 = dma.done.wait [#allocation6], 2048  }
  0x27   :  { %1224 = vsyncadd [#allocation6], 4294965248  ;;  %v1233_v0 = vmov 0   ;;  %v64_v1 = vld [vmem:[%s1500_s0 + $0x10] sm:$0xff]  ;;  %v62_v2 = vld [vmem:[%s1500_s0] sm:$0xff]  ;;  %v68_v31 = vlaneseq  ;;  %v1234_v35 = vmov 1.0  }
  0x28   :  { %1096 = vset.pattern.permute.xlu1 %v1233_v0  ;;  %1095 = vset.pattern.permute.xlu0 %v1233_v0  ;;  %v65_v3 = vld [vmem:[%s1500_s0 + $0x18] sm:$0xff]  ;;  %v63_v4 = vld [vmem:[%s1500_s0 + $0x8] sm:$0xff]  ;;  %v106_v5 = vld [vmem:[#allocation2] sm:$0xff]  ;;  %v1235_v50 = vmov 0.0   ;;  %vm335_vm10 = vcmask 191488   ;;  %vm1237_vm11 = vmmov 0  }
  0x29   :  { %77 = vperm.xlu1 %1096, %v64_v1   ;;  %71 = vperm.xlu0 %1095, %v62_v2   ;;  %v107_v6 = vld [vmem:[#allocation2 + $0x8] sm:$0xff]  ;;  %v108_v7 = vld [vmem:[#allocation2 + $0x10] sm:$0xff]  ;;  %v109_v9 = vld [vmem:[#allocation2 + $0x18] sm:$0xff]  ;;  %v69_v32 = vand.u32 127, %v68_v31  ;;  %v1358_v63 = vshrl.u32 %v68_v31, 7  ;;  %vm339_vm12 = vcmask 195584  }
  0x2a   :  { %v976_v8 = vpack.c.bf16 %v107_v6, %v106_v5  ;;  %v980_v10 = vpack.c.bf16 %v109_v9, %v108_v7  ;;  %v110_v11 = vld [vmem:[#allocation2 + $0x20] sm:$0xff]  ;;  %v111_v12 = vld [vmem:[#allocation2 + $0x28] sm:$0xff]  ;;  %v112_v16 = vld [vmem:[#allocation2 + $0x30] sm:$0xff]  ;;  %v1236_v6 = vmov 0.0|0.0   ;;  %897 = vmatprep.mubr.msk.f32.mxu1 %vm1237_vm11, %v1235_v50  ;;  %vm655_vm13 = vcmask 1043456  }
  0x2b   :  { %v67_v13 = vld [vmem:[%s1500_s0 + $0x28] sm:$0xff]  ;;  %v66_v14 = vld [vmem:[%s1500_s0 + $0x20] sm:$0xff]  ;;  %v984_v15 = vpack.c.bf16 %v111_v12, %v110_v11  ;;  %v113_v17 = vld [vmem:[#allocation2 + $0x38] sm:$0xff]  ;;  %vm217_vm6 = vcmp.lt.s32.totalorder %v69_v32, 32  ;;  %v320_v0 = vmul.u32 5, %v1358_v63  ;;  %1011 = vmatprep.subr.bf16.mxu1 %v1236_v6 }
  0x2c   :  { %977 = vmatprep.subr.bf16.mxu0 %v976_v8  ;;  %v988_v18 = vpack.c.bf16 %v113_v17, %v112_v16  ;;  %v114_v19 = vld [vmem:[#allocation2 + $0x40] sm:$0xff]  ;;  %v115_v20 = vld [vmem:[#allocation2 + $0x48] sm:$0xff]  ;;  %v116_v22 = vld [vmem:[#allocation2 + $0x50] sm:$0xff]  ;;  %v730_v51 = vsel %vm217_vm6, 1.0, %v1235_v50 }
  0x2d   :  { %80 = vperm.xlu1 %1096, %v65_v3   ;;  %74 = vperm.xlu0 %1095, %v63_v4   ;;  %v992_v21 = vpack.c.bf16 %v115_v20, %v114_v19  ;;  %v117_v23 = vld [vmem:[#allocation2 + $0x58] sm:$0xff]  ;;  %v118_v25 = vld [vmem:[#allocation2 + $0x60] sm:$0xff]  ;;  %v119_v26 = vld [vmem:[#allocation2 + $0x68] sm:$0xff]  ;;  %v322_v1 = vadd.s32 5, %v320_v0  ;;  %vm321_vm7 = vcmp.ge.s32.totalorder %v69_v32, %v320_v0 }
  0x2e   :  { %979 = vmatpush3.bf16.msra.mxu0 %v976_v8  ;;  %v996_v24 = vpack.c.bf16 %v117_v23, %v116_v22  ;;  %v1000_v27 = vpack.c.bf16 %v119_v26, %v118_v25  ;;  %v120_v28 = vld [vmem:[#allocation2 + $0x70] sm:$0xff]  ;;  %v121_v29 = vld [vmem:[#allocation2 + $0x78] sm:$0xff]  ;;  %v734_v3 = vld [vmem:[%s1501_s1] ss:$0 sm:$0xff] }
  0x2f   :  { %981 = vmatprep.subr.bf16.mxu0 %v980_v10  ;;  %v1004_v30 = vpack.c.bf16 %v121_v29, %v120_v28  ;;  %vm323_vm8 = vcmp.lt.s32.totalorder %v69_v32, %v322_v1  ;;  %v1387_v31 = vld [vmem:[%s1504_s4] ss:$0 sm:$0xff]  ;;  %v425_v0 = vld [vmem:[#allocation5 + $0x50] sm:$0xff]  ;;  %v426_v1 = vld [vmem:[#allocation5 + $0x58] sm:$0xff] }
  0x30   :  { %vm324_vm9 = vmand %vm321_vm7, %vm323_vm8 }
  0x31   :  { %86 = vperm.xlu1 %1096, %v67_v13   ;;  %83 = vperm.xlu0 %1095, %v66_v14   ;;  %v733_v2 = vsel %vm324_vm9, 1.0, %v1235_v50 }
  0x32   :  { %983 = vmatpush3.bf16.msra.mxu0 %v980_v10  ;;  %v334_v4 = vmul.f32 %v734_v3, %v733_v2  ;;  %v1027_v2 = vpack.c.bf16 %v426_v1, %v425_v0  ;;  %v427_v3 = vld [vmem:[#allocation5 + $0x60] sm:$0xff] }
  0x33   :  { %985 = vmatprep.subr.bf16.mxu0 %v984_v15 }
  0x34   :  { %v336_v5 = vsel %vm335_vm10, %v334_v4, 0.0 }
  0x36   :  { %987 = vmatpush3.bf16.msra.mxu0 %v984_v15 }
  0x37   :  { %989 = vmatprep.subr.bf16.mxu0 %v988_v18 }
  0x3a   :  { %991 = vmatpush3.bf16.msra.mxu0 %v988_v18 }
  0x3b   :  { %993 = vmatprep.subr.bf16.mxu0 %v992_v21 }
  0x3e   :  { %995 = vmatpush3.bf16.msra.mxu0 %v992_v21 }
  0x3f   :  { %997 = vmatprep.subr.bf16.mxu0 %v996_v24 }
  0x42   :  { %999 = vmatpush3.bf16.msra.mxu0 %v996_v24 }
  0x43   :  { %1001 = vmatprep.subr.bf16.mxu0 %v1000_v27 }
  0x46   :  { %1003 = vmatpush3.bf16.msra.mxu0 %v1000_v27 }
  0x47   :  { %1005 = vmatprep.subr.bf16.mxu0 %v1004_v30 }
  0x4a   :  { %1007 = vmatpush3.bf16.msra.mxu0 %v1004_v30 }
  0x4b   :  { %1008 = vmatprep.subr.bf16.mxu0 %v1236_v6 }
  0xa8   :  { %v78_v33 = vpop.permute.xlu1 %77  ;;  %v72_v34 = vpop.permute.xlu0 %71 }
  0xa9   :  { %vm88_vm0 = vcmp.eq.s32.totalorder %v69_v32, %v72_v34  ;;  %vm90_vm1 = vcmp.eq.s32.totalorder %v69_v32, %v78_v33 }
  0xaa   :  { %847 = vmatprep.mubr.msk.f32.mxu0 %vm88_vm0, %v1234_v35 }
  0xac   :  { %v81_v36 = vpop.permute.xlu1 %80  ;;  %v75_v37 = vpop.permute.xlu0 %74 }
  0xad   :  { %vm89_vm2 = vcmp.eq.s32.totalorder %v69_v32, %v75_v37  ;;  %vm91_vm3 = vcmp.eq.s32.totalorder %v69_v32, %v81_v36  ;;  %v1394_v36 = vld [vmem:[%s1505_s5] ss:$0 sm:$0xff] }
  0xae   :  { %848 = vmatmul.mubr.msk.f32.vlgmr.msra.gmra.mrb[0].mxu0 %vm89_vm2, %v1234_v35 }
  0xaf   :  { %850 = vmatprep.mubr.msk.f32.mxu0 %vm90_vm1, %v1234_v35 }
  0xb0   :  { %v84_v38 = vpop.permute.xlu0 %83  ;;  %v87_v39 = vpop.permute.xlu1 %86 }
  0xb1   :  { %vm92_vm4 = vcmp.eq.s32.totalorder %v69_v32, %v84_v38  ;;  %vm93_vm5 = vcmp.eq.s32.totalorder %v69_v32, %v87_v39 }
  0xb2   :  { %851 = vmatmul.mubr.msk.f32.gmra.mrb[2].mxu0 %vm91_vm3, %v1234_v35 }
  0xb3   :  { %853 = vmatprep.mubr.msk.f32.mxu0 %vm92_vm4, %v1234_v35 }
  0xb6   :  { %854 = vmatmul.mubr.msk.f32.gmra.mrb[4].mxu0 %vm93_vm5, %v1234_v35 }
  0xb7   :  { %862 = vmatprep.mubr.msk.f32.mxu0 %vm1237_vm11, %v1235_v50 }
 0x181   :  { %v849_v40 = vpop.f32.mrb[0].mxu0 }
 0x182   :  { %222 = vadd.xlane.f32.xlu1 %v849_v40  ;;  %v188_v41 = vpop.f32.mrb[1].mxu0 }
 0x183   :  { %220 = vadd.xlane.f32.xlu0 %v188_v41 }
 0x185   :  { %v1344_v42 = vpop.f32.mrb[2].mxu0 }
 0x186   :  { %v198_v43 = vpop.f32.mrb[3].mxu0 }
 0x187   :  { %224 = vadd.xlane.f32.xlu0 %v198_v43 }
 0x189   :  { %v1346_v44 = vpop.f32.mrb[4].mxu0 }
 0x18a   :  { %v1348_v45 = vpop.f32.mrb[5].mxu0 }
 0x20f   :  { %v223_v46 = vpop.xlane.xlu1 %222 }
 0x210   :  { %v233_v47 = vmul.f32 0.03125, %v223_v46  ;;  %v221_v48 = vpop.xlane.xlu0 %220  ;;  %v657_v46 = vld [vmem:[%s1502_s2] sm:$0xff] }
 0x211   :  { %v232_v49 = vmul.f32 0.03125, %v221_v48  ;;  %v416_v48 = vld [vmem:[#allocation5 + $0x8] sm:$0xff] }
 0x212   :  { %v239_v52 = vsub.f32 %v849_v40, %v233_v47  ;;  %v415_v47 = vld [vmem:[#allocation5] sm:$0xff] }
 0x213   :  { %v238_v53 = vsub.f32 %v188_v41, %v232_v49  ;;  %v417_v49 = vld [vmem:[#allocation5 + $0x10] sm:$0xff] }
 0x214   :  { %v225_v54 = vpop.xlane.xlu0 %224  ;;  %v245_v55 = vmul.f32 %v730_v51, %v239_v52  ;;  %v418_v52 = vld [vmem:[#allocation5 + $0x18] sm:$0xff] }
 0x215   :  { %v234_v56 = vmul.f32 0.03125, %v225_v54  ;;  %v244_v57 = vmul.f32 %v730_v51, %v238_v53  ;;  %v1410_v53 = vpack.c.bf16 %v418_v52, %v417_v49  ;;  %v419_v54 = vld [vmem:[#allocation5 + $0x20] sm:$0xff] }
 0x216   :  { %v251_v58 = vmul.f32 %v245_v55, %v245_v55 }
 0x217   :  { %v240_v59 = vsub.f32 %v198_v43, %v234_v56  ;;  %v250_v60 = vmul.f32 %v244_v57, %v244_v57 }
 0x218   :  { %258 = vadd.xlane.f32.xlu1 %v251_v58  ;;  %v422_v58 = vld [vmem:[#allocation5 + $0x38] sm:$0xff] }
 0x219   :  { %256 = vadd.xlane.f32.xlu0 %v250_v60  ;;  %v1351_v61 = vmul.f32 %v730_v51, %v240_v59  ;;  %v423_v60 = vld [vmem:[#allocation5 + $0x40] sm:$0xff] }
 0x21b   :  { %v252_v62 = vmul.f32 %v1351_v61, %v1351_v61 }
 0x21c   :  { %226 = vadd.xlane.f32.xlu1 %v1344_v42 }
 0x21d   :  { %260 = vadd.xlane.f32.xlu0 %v252_v62 }
 0x220   :  { %230 = vadd.xlane.f32.xlu1 %v1346_v44 }
 0x221   :  { %228 = vadd.xlane.f32.xlu0 %v1348_v45 }
 0x225   :  { %337 = vadd.xlane.f32.xlu0 %v336_v5 }
 0x2a5   :  { %v259_v7 = vpop.xlane.xlu1 %258 }
 0x2a6   :  { %v269_v8 = vmul.f32 0.03125, %v259_v7  ;;  %v257_v9 = vpop.xlane.xlu0 %256  ;;  %v429_v7 = vld [vmem:[#allocation5 + $0x70] sm:$0xff] }
 0x2a7   :  { %v268_v10 = vmul.f32 0.03125, %v257_v9 }
 0x2a8   :  { %v275_v11 = vadd.f32 1e-05, %v269_v8  ;;  %v430_v8 = vld [vmem:[#allocation5 + $0x78] sm:$0xff] }
 0x2a9   :  { %v274_v12 = vadd.f32 1e-05, %v268_v10  ;;  %v227_v13 = vpop.xlane.xlu1 %226  ;;  %v1033_v9 = vpack.c.bf16 %v430_v8, %v429_v7  ;;  %v501_v10 = vld [vmem:[%s1506_s6] sm:$0x1]  ;;  %s1238_s6 = smov [#allocation7]  }
 0x2aa   :  { %1097 = vrsqrt.f32 %v275_v11  ;;  %v235_v14 = vmul.f32 0.03125, %v227_v13  ;;  %v261_v15 = vpop.xlane.xlu0 %260  ;;  %s679_s17 = sshll.u32 %s1238_s6, 4  ;;  %s680_s17 = int_to_ptr.vmem [resolvable:$true] %s679_s17 }
 0x2ab   :  { %1099 = vrsqrt.f32 %v274_v12  ;;  %v270_v16 = vmul.f32 0.03125, %v261_v15  ;;  %s1155_s3 = scalar_lea.vmem %s680_s17, 128  ;;  %p1160_p3 = scmp.lt.s32.totalorder %s680_s17, %s680_s17 }
 0x2ac   :  { %v241_v17 = vsub.f32 %v1344_v42, %v235_v14  ;;  %p1156_p2 = scmp.ne.s32.totalorder %s680_s17, %s1155_s3  ;;  %p1161_p4 = scmp.lt.s32.totalorder %s1155_s3, %s1155_s3 }
 0x2ad   :  { %v276_v18 = vadd.f32 1e-05, %v270_v16  ;;  %v231_v19 = vpop.xlane.xlu1 %230 }
 0x2ae   :  { %v237_v20 = vmul.f32 0.03125, %v231_v19  ;;  %v229_v21 = vpop.xlane.xlu0 %228  ;;  %v1372_v22 = vmul.f32 %v730_v51, %v241_v17  ;;  %p1162_p5 = por %p1161_p4, %p1160_p3 }
 0x2af   :  { %1101 = vrsqrt.f32 %v276_v18  ;;  %v236_v23 = vmul.f32 0.03125, %v229_v21 }
 0x2b0   :  { %v243_v24 = vsub.f32 %v1346_v44, %v237_v20  ;;  %v253_v25 = vmul.f32 %v1372_v22, %v1372_v22  ;;  %p1163_p6 = pnand %p1162_p5, %p1156_p2 }
 0x2b1   :  { %v242_v26 = vsub.f32 %v1348_v45, %v236_v23 }
 0x2b2   :  { %262 = vadd.xlane.f32.xlu1 %v253_v25  ;;  %v1378_v27 = vmul.f32 %v730_v51, %v243_v24  ;;  %v338_v11 = vpop.xlane.xlu0 %337 }
 0x2b3   :  { %v1380_v28 = vmul.f32 %v730_v51, %v242_v26  ;;  %v1012_v51 = vpack.c.bf16 %v416_v48, %v415_v47  ;;  %1103 = vrcp.f32 %v338_v11 }
 0x2b4   :  { %v1098_v29 = vpop.eup %1097  ;;  %v255_v30 = vmul.f32 %v1378_v27, %v1378_v27 }
 0x2b5   :  { %v1100_v32 = vpop.eup %1099  ;;  %v287_v33 = vmul.f32 %v1098_v29, %v245_v55  ;;  %v254_v34 = vmul.f32 %v1380_v28, %v1380_v28  ;;  %1013 = vmatpush3.bf16.msra.mxu1 %v1012_v51  ;;  %v420_v55 = vld [vmem:[#allocation5 + $0x28] sm:$0xff] }
 0x2b6   :  { %v286_v35 = vmul.f32 %v1100_v32, %v244_v57  ;;  %266 = vadd.xlane.f32.xlu1 %v255_v30  ;;  %1014 = vmatprep.subr.bf16.mxu1 %v1236_v6  ;;  %v1415_v56 = vpack.c.bf16 %v420_v55, %v419_v54  ;;  %v421_v57 = vld [vmem:[#allocation5 + $0x30] sm:$0xff] }
 0x2b7   :  { %264 = vadd.xlane.f32.xlu0 %v254_v34  ;;  %v300_v37 = vmul.f32 %v1387_v31, %v287_v33  ;;  %v1021_v59 = vpack.c.bf16 %v422_v58, %v421_v57 }
 0x2b8   :  { %v299_v38 = vmul.f32 %v1387_v31, %v286_v35 }
 0x2b9   :  { %v1102_v39 = vpop.eup %1101  ;;  %v313_v40 = vadd.f32 %v1394_v36, %v300_v37  ;;  %1016 = vmatpush3.bf16.msra.mxu1 %v1410_v53 }
 0x2ba   :  { %v312_v41 = vadd.f32 %v1394_v36, %v299_v38  ;;  %v288_v42 = vmul.f32 %v1102_v39, %v1351_v61  ;;  %1017 = vmatprep.subr.bf16.mxu1 %v1236_v6  ;;  %v424_v61 = vld [vmem:[#allocation5 + $0x48] sm:$0xff] }
 0x2bb   :  { %v1024_v62 = vpack.c.bf16 %v424_v61, %v423_v60 }
 0x2bc   :  { %v1009_v43 = vpack.c.bf16 %v313_v40, %v312_v41  ;;  %v301_v44 = vmul.f32 %v1387_v31, %v288_v42  ;;  %v666_v41 = vsub.s32 0, %v1358_v63 }
 0x2bd   :  { %1019 = vmatpush3.bf16.msra.mxu1 %v1415_v56  ;;  %v1104_v12 = vpop.eup %1103 }
 0x2be   :  { %1010 = vmatpush3.bf16.msra.mxu0 %v1009_v43  ;;  %v314_v45 = vadd.f32 %v1394_v36, %v301_v44  ;;  %1020 = vmatprep.subr.bf16.mxu1 %v1236_v6 }
 0x2bf   :  { %860 = vmatprep.subr.mxu0 %v1235_v50 }
 0x2c1   :  { %1022 = vmatpush3.bf16.msra.mxu1 %v1021_v59 }
 0x2c2   :  { %861 = vmatpush3.msra.mxu0 %v314_v45  ;;  %1023 = vmatprep.subr.bf16.mxu1 %v1236_v6 }
 0x2c3   :  { %863 = vmatmul.mubr.msk.f32.vlgmr.msra.gmra.mrb[6].mxu0 %vm339_vm12, %v334_v4  ;;  %1035 = vmatprep.subr.bf16.mxu0 %v1236_v6  ;;  %v428_v4 = vld [vmem:[#allocation5 + $0x68] sm:$0xff] }
 0x2c4   :  { %932 = vmatprep.mubr.msk.f32.mxu0 %vm1237_vm11, %v1235_v50  ;;  %1037 = vmatpush3.bf16.msra.mxu0 %v1012_v51  ;;  %v1030_v5 = vpack.c.bf16 %v428_v4, %v427_v3 }
 0x2c5   :  { %1038 = vmatprep.subr.bf16.mxu0 %v1236_v6  ;;  %1025 = vmatpush3.bf16.msra.mxu1 %v1024_v62 }
 0x2c6   :  { %1026 = vmatprep.subr.bf16.mxu1 %v1236_v6 }
 0x2c8   :  { %1040 = vmatpush3.bf16.msra.mxu0 %v1410_v53 }
 0x2c9   :  { %1041 = vmatprep.subr.bf16.mxu0 %v1236_v6  ;;  %1028 = vmatpush3.bf16.msra.mxu1 %v1027_v2 }
 0x2ca   :  { %1029 = vmatprep.subr.bf16.mxu1 %v1236_v6 }
 0x2cc   :  { %1043 = vmatpush3.bf16.msra.mxu0 %v1415_v56 }
 0x2cd   :  { %660 = vperm.xlu0 %1095, %v657_v46   ;;  %1044 = vmatprep.subr.bf16.mxu0 %v1236_v6 }
 0x2ce   :  { %1031 = vmatpush3.bf16.msra.mxu1 %v1030_v5 }
 0x2cf   :  { %1032 = vmatprep.subr.bf16.mxu1 %v1236_v6 }
 0x2d0   :  { %1046 = vmatpush3.bf16.msra.mxu0 %v1021_v59 }
 0x2d1   :  { %1047 = vmatprep.subr.bf16.mxu0 %v1236_v6 }
 0x2d2   :  { %1034 = vmatpush3.bf16.msra.mxu1 %v1033_v9 }
 0x2d3   :  { %1059 = vmatprep.subr.bf16.mxu1 %v1236_v6 }
 0x2d4   :  { %1049 = vmatpush3.bf16.msra.mxu0 %v1024_v62 }
 0x2d5   :  { %1050 = vmatprep.subr.bf16.mxu0 %v1236_v6 }
 0x2d8   :  { %1052 = vmatpush3.bf16.msra.mxu0 %v1027_v2 }
 0x2d9   :  { %1053 = vmatprep.subr.bf16.mxu0 %v1236_v6 }
 0x2dc   :  { %1055 = vmatpush3.bf16.msra.mxu0 %v1030_v5 }
 0x2dd   :  { %1056 = vmatprep.subr.bf16.mxu0 %v1236_v6 }
 0x2e0   :  { %1058 = vmatpush3.bf16.msra.mxu0 %v1033_v9 }
 0x2e3   :  { %933 = vmatmul.mubr.f32.vlgmr.msra.gmra.mrb[8].mxu0 %v501_v10 }
 0x33f   :  { %v263_v14 = vpop.xlane.xlu1 %262 }
 0x340   :  { %v271_v17 = vmul.f32 0.03125, %v263_v14 }
 0x342   :  { %v277_v19 = vadd.f32 1e-05, %v271_v17 }
 0x343   :  { %v267_v21 = vpop.xlane.xlu1 %266 }
 0x344   :  { %v265_v18 = vpop.xlane.xlu0 %264  ;;  %1105 = vrsqrt.f32 %v277_v19  ;;  %v273_v23 = vmul.f32 0.03125, %v267_v21 }
 0x345   :  { %v272_v20 = vmul.f32 0.03125, %v265_v18 }
 0x346   :  { %v279_v25 = vadd.f32 1e-05, %v273_v23 }
 0x347   :  { %v278_v24 = vadd.f32 1e-05, %v272_v20 }
 0x349   :  { %1107 = vrsqrt.f32 %v278_v24 }
 0x34a   :  { %1109 = vrsqrt.f32 %v279_v25 }
 0x34c   :  { %v661_v45 = vpop.permute.xlu0 %660 }
 0x34e   :  { %v1106_v26 = vpop.eup %1105 }
 0x34f   :  { %v289_v29 = vmul.f32 %v1106_v26, %v1372_v22 }
 0x351   :  { %v302_v32 = vmul.f32 %v1387_v31, %v289_v29 }
 0x353   :  { %v1108_v30 = vpop.eup %1107  ;;  %v315_v35 = vadd.f32 %v1394_v36, %v302_v32 }
 0x354   :  { %v290_v33 = vmul.f32 %v1108_v30, %v1380_v28  ;;  %v1110_v34 = vpop.eup %1109 }
 0x355   :  { %v291_v38 = vmul.f32 %v1110_v34, %v1378_v27 }
 0x356   :  { %v303_v37 = vmul.f32 %v1387_v31, %v290_v33 }
 0x358   :  { %v316_v22 = vadd.f32 %v1394_v36, %v303_v37 }
 0x396   :  { %v409_v13 = vpop.f32.mrb[6].mxu0 }
 0x397   :  { %v414_v15 = vmul.f32 %v1104_v12, %v409_v13  ;;  %v864_v16 = vpop.f32.mrb[7].mxu0 }
 0x399   :  { %898 = vmatmul.mubr.f32.vlgmr.msra.gmra.mrb[0].mxu1 %v414_v15 }
 0x39a   :  { %1061 = vmatpush3.bf16.msra.mxu1 %v1012_v51  ;;  %967 = vmatprep.mubr.msk.f32.mxu1 %vm1237_vm11, %v1235_v50 }
 0x39b   :  { %1062 = vmatprep.subr.bf16.mxu1 %v1236_v6 }
 0x39e   :  { %1064 = vmatpush3.bf16.msra.mxu1 %v1410_v53 }
 0x39f   :  { %1065 = vmatprep.subr.bf16.mxu1 %v1236_v6 }
 0x3a2   :  { %1067 = vmatpush3.bf16.msra.mxu1 %v1415_v56 }
 0x3a3   :  { %1068 = vmatprep.subr.bf16.mxu1 %v1236_v6 }
 0x3a6   :  { %1070 = vmatpush3.bf16.msra.mxu1 %v1021_v59 }
 0x3a7   :  { %1071 = vmatprep.subr.bf16.mxu1 %v1236_v6 }
 0x3aa   :  { %1073 = vmatpush3.bf16.msra.mxu1 %v1024_v62 }
 0x3ab   :  { %1074 = vmatprep.subr.bf16.mxu1 %v1236_v6 }
 0x3ae   :  { %1076 = vmatpush3.bf16.msra.mxu1 %v1027_v2 }
 0x3af   :  { %1077 = vmatprep.subr.bf16.mxu1 %v1236_v6 }
 0x3b2   :  { %1079 = vmatpush3.bf16.msra.mxu1 %v1030_v5 }
 0x3b3   :  { %1080 = vmatprep.subr.bf16.mxu1 %v1236_v6  ;;  %v304_v6 = vmul.f32 %v1387_v31, %v291_v38 }
 0x3b5   :  { %v317_v28 = vadd.f32 %v1394_v36, %v304_v6 }
 0x3b6   :  { %1082 = vmatpush3.bf16.msra.mxu1 %v1033_v9  ;;  %v568_v39 = vpop.f32.mrb[8].mxu0 }
 0x3b7   :  { %v934_v40 = vpop.f32.mrb[9].mxu0  ;;  %v667_v44 = vrot.slane %v568_v39, %v666_v41 }
 0x3b9   :  { %968 = vmatmul.mubr.f32.vlgmr.msra.gmra.mrb[2].mxu1 %v315_v35 }
 0x3ba   :  { %970 = vmatprep.mubr.msk.f32.mxu1 %vm1237_vm11, %v1235_v50 }
 0x3bd   :  { %971 = vmatmul.mubr.f32.gmra.mrb[4].mxu1 %v316_v22 }
 0x3be   :  { %973 = vmatprep.mubr.msk.f32.mxu1 %vm1237_vm11, %v1235_v50 }
 0x3c1   :  { %974 = vmatmul.mubr.f32.gmra.mrb[6].mxu1 %v317_v28 }
 0x46c   :  { %v497_v27 = vpop.f32.mrb[0].mxu1 }
 0x46d   :  { %v653_v42 = vrot.slane %v497_v27, 4  ;;  %v899_v43 = vpop.f32.mrb[1].mxu1 }
 0x46f   :  { %v656_v46 = vsel %vm655_vm13, %v497_v27, %v653_v42 }
 0x470   :  { %v663_v31 = vmul.f32 %v661_v45, %v656_v46 }
 0x472   :  { %v668_v47 = vadd.f32 %v667_v44, %v663_v31 }
 0x474   :  { %669 = vst [vmem:[#allocation7] sm:$0xff] %v668_v47 }
 0x475   :  { %1166 = shalt.err (!%p1163_p6)
}
 0x476   :  { %s1167_s19 = scalar_lea.hbm %s1508_s8, 128 }
 0x477   :  { %p1168_p7 = scmp.ne.s32.totalorder %s1508_s8, %s1167_s19  ;;  %p1171_p8 = scmp.lt.u32.totalorder %s1167_s19, %s1508_s8 }
 0x479   :  { %p1173_p9 = pnand %p1171_p8, %p1168_p7 }
 0x47b   :  { %1176 = shalt.err (!%p1173_p9)
}
 0x47c   :  { %682 = dma.vmem_to_hbm [thread:$0]  %s680_s17, 128, %s1508_s8, [#allocation4]  }
 0x47d   :  { %s1239_s27 = smov [#allocation8]   ;;  %s1240_s29 = smov [#allocation10]  }
 0x47e   :  { %s688_s28 = sshll.u32 %s1239_s27, 4  ;;  %s701_s30 = sshll.u32 %s1240_s29, 4  ;;  %s689_s28 = int_to_ptr.vmem [resolvable:$true] %s688_s28  ;;  %s702_s30 = int_to_ptr.vmem [resolvable:$true] %s701_s30 }
 0x47f   :  { %s1177_s0 = scalar_lea.vmem %s689_s28, 256  ;;  %p1182_p11 = scmp.lt.s32.totalorder %s689_s28, %s689_s28 }
 0x480   :  { %p1178_p10 = scmp.ne.s32.totalorder %s689_s28, %s1177_s0  ;;  %p1183_p12 = scmp.lt.s32.totalorder %s1177_s0, %s1177_s0 }
 0x482   :  { %p1184_p13 = por %p1183_p12, %p1182_p11 }
 0x484   :  { %p1185_p0 = pnand %p1184_p13, %p1178_p10 }
 0x48c   :  { %v638_v50 = vpop.f32.mrb[2].mxu1 }
 0x48d   :  { %670 = vst [vmem:[#allocation8] sm:$0xff] %v638_v50  ;;  %v969_v63 = vpop.f32.mrb[3].mxu1 }
 0x490   :  { %v643_v36 = vpop.f32.mrb[4].mxu1 }
 0x491   :  { %671 = vst [vmem:[#allocation8 + $0x8] sm:$0xff] %v643_v36  ;;  %v972_v48 = vpop.f32.mrb[5].mxu1 }
 0x492   :  { %1188 = shalt.err (!%p1185_p0)
}
 0x493   :  { %s1189_s1 = scalar_lea.hbm %s1509_s9, 256 }
 0x494   :  { %p1190_p1 = scmp.ne.s32.totalorder %s1509_s9, %s1189_s1  ;;  %p1193_p2 = scmp.lt.u32.totalorder %s1189_s1, %s1509_s9 }
 0x496   :  { %p1195_p3 = pnand %p1193_p2, %p1190_p1 }
 0x498   :  { %1198 = shalt.err (!%p1195_p3)
}
 0x499   :  { %694 = dma.vmem_to_hbm [thread:$0]  %s689_s28, 256, %s1509_s9, [#allocation9], %s1230_s23, %s1230_s23, %s1231_s24   ;;  %v648_v49 = vpop.f32.mrb[6].mxu1 }
 0x49a   :  { %672 = vst [vmem:[#allocation10] sm:$0xff] %v648_v49  ;;  %v975_v51 = vpop.f32.mrb[7].mxu1  ;;  %s1199_s16 = scalar_lea.vmem %s702_s30, 128  ;;  %p1204_p5 = scmp.lt.s32.totalorder %s702_s30, %s702_s30 }
 0x49b   :  { %p1200_p4 = scmp.ne.s32.totalorder %s702_s30, %s1199_s16  ;;  %p1205_p6 = scmp.lt.s32.totalorder %s1199_s16, %s1199_s16 }
 0x49d   :  { %p1206_p7 = por %p1205_p6, %p1204_p5 }
 0x49f   :  { %p1207_p8 = pnand %p1206_p7, %p1200_p4 }
 0x4a1   :  { %1210 = shalt.err (!%p1207_p8)
}
 0x4a2   :  { %s1211_s3 = scalar_lea.hbm %s1510_s10, 128 }
 0x4a3   :  { %p1212_p9 = scmp.ne.s32.totalorder %s1510_s10, %s1211_s3  ;;  %p1215_p10 = scmp.lt.u32.totalorder %s1211_s3, %s1510_s10 }
 0x4a5   :  { %p1217_p11 = pnand %p1215_p10, %p1212_p9 }
 0x4a7   :  { %1220 = shalt.err (!%p1217_p11)
}
 0x4a8   :  { %704 = dma.vmem_to_hbm [thread:$0]  %s702_s30, 128, %s1510_s10, [#allocation9]  }
 0x4a9   :  { %1225 = dma.done.wait [#allocation4], 128  }
 0x4aa   :  { %1226 = vsyncadd [#allocation4], 4294967168 }
 0x4ab   :  { %1227 = dma.done.wait [#allocation9], 384  }
 0x4ac   :  { %1228 = vsyncadd [#allocation9], 4294966912 }
 0x4ad   :  { %714 = vsyncpa [#allocation3], 1 }
 0x4ae   :  { %715 = vsyncpa [#allocation6], 1 }
 0x4af   :  { %716 = vsyncpa [#allocation4], 1 }
 0x4b0   :  { %717 = vsyncpa [#allocation9], 1 }

</bundles_post_ra>
